<compile_context>
chip_gen: v7x
topology: tpu7x:2x2x1
jax: 0.10.0
libtpu: 0.0.40
codegen_flags: <defaults>
</compile_context>

<pallas_src>
import jax
import jax.numpy as jnp
from jax.experimental import pallas as pl
from jax.experimental.pallas import tpu as pltpu


def _bilinear_upsample_kernel(x_ref, mh_ref, mwt_ref, o_ref):
    """One grid step: upsample `bc` independent planes.

    x_ref  : (bc, H_in,  W_in)   streamed input planes
    mh_ref : (H_out, H_in)       row-interp matrix (resident in VMEM)
    mwt_ref: (W_in,  W_out)      column-interp matrix, transposed (resident)
    o_ref  : (bc, H_out, W_out)  streamed output planes
    """
    bc, h_in, w_in = x_ref.shape
    h_out = mh_ref.shape[0]
    w_out = mwt_ref.shape[1]

    # ---- H interpolation: batched MXU matmul ('bij,bjk->bik') ----
    # Broadcasting mh over the plane dim is transient (values only): no
    # bc-scaled resident VMEM buffer and no extra HBM traffic.
    mh_b = jnp.broadcast_to(mh_ref[...][None], (bc, h_out, h_in))
    th = jax.lax.dot_general(
        mh_b, x_ref[...],
        dimension_numbers=(((2,), (1,)), ((0,), (0,))),
        preferred_element_type=jnp.float32)                 # (bc, H_out, W_in) f32

    # ---- W interpolation: one fat flat MXU matmul over all rows of the block.
    # Merging (bc, H_out) -> bc*H_out is layout-preserving when H_out is a
    # multiple of the sublane tile (8 for f32 operands, 16 for bf16); otherwise
    # Mosaic inserts a relayout copy (still correct, just slower).
    th2 = th.astype(mwt_ref.dtype).reshape(bc * h_out, w_in)
    tw = jnp.dot(th2, mwt_ref[...], preferred_element_type=jnp.float32)
    o_ref[...] = tw.reshape(bc, h_out, w_out).astype(o_ref.dtype)


def _interp_matrix(in_size, out_size):
    """Dense (out_size, in_size) matrix reproducing PyTorch bilinear
    interpolation (align_corners=False) along one axis."""
    scale = in_size / out_size
    dst = jnp.arange(out_size, dtype=jnp.float32)
    src = jnp.maximum((dst + 0.5) * scale - 0.5, 0.0)        # PyTorch clamps at 0
    lo = jnp.floor(src)
    frac = src - lo
    lo_i = lo.astype(jnp.int32)
    hi_i = jnp.minimum(lo_i + 1, in_size - 1)
    cols = jnp.arange(in_size, dtype=jnp.int32)[None, :]
    m = ((cols == lo_i[:, None]).astype(jnp.float32) * (1.0 - frac)[:, None]
         + (cols == hi_i[:, None]).astype(jnp.float32) * frac[:, None])
    return m                                                 # (out_size, in_size)


def _round_up(x, m):
    return (x + m - 1) // m * m


def _tile_bytes(rows, cols, itemsize):
    """VMEM bytes of a (rows, cols) tile after (sublane, lane) padding."""
    sublane = max(8, 32 // max(itemsize, 1))   # 8 for 4B, 16 for 2B, 32 for 1B
    return _round_up(rows, sublane) * _round_up(cols, 128) * itemsize


def upsample_unet_forward(x_nchw, out_hw):
    """Bilinear (align_corners=False) upsample of an NCHW tensor to (H_out, W_out)."""
    n, c, h_in, w_in = x_nchw.shape
    h_out, w_out = int(out_hw[0]), int(out_hw[1])
    nc = n * c

    x = x_nchw
    if not jnp.issubdtype(x.dtype, jnp.floating):
        x = x.astype(jnp.float32)   # bilinear needs a float dtype
    dt = x.dtype
    isz = jnp.dtype(dt).itemsize

    x_planes = x.reshape(nc, h_in, w_in)
    mh = _interp_matrix(h_in, h_out).astype(dt)        # (H_out, H_in)
    mwt = _interp_matrix(w_in, w_out).T.astype(dt)     # (W_in,  W_out)

    # ---- padded-tile VMEM model -> planes per grid step (bc) ----
    per_plane = (
        2 * _tile_bytes(h_in, w_in, isz)          # streamed input block, double-buffered
        + 2 * _tile_bytes(h_out, w_out, isz)      # streamed output block, double-buffered
        + _tile_bytes(h_out, h_in, isz)           # transient broadcast H-matrix operand
        + _tile_bytes(h_out, w_in, 4)             # th intermediate (f32 accumulation)
        + _tile_bytes(h_out, w_out, 4)            # tw before cast (f32 accumulation)
    )
    resident = 2 * (_tile_bytes(h_out, h_in, isz) + _tile_bytes(w_in, w_out, isz))

    try:
        vmem_cap = int(pltpu.get_tpu_info().vmem_capacity_bytes)
    except Exception:
        vmem_cap = 64 * 2**20                     # conservative fallback: v7x per-core VMEM
    vmem_limit = int(min(100 * 2**20, (vmem_cap * 7) // 8))

    headroom = 8 * 2**20                          # compiler-internal scratch etc.
    budget = min(28 * 2**20,
                 max(per_plane, (vmem_limit - resident - headroom) * 2 // 5))

    # Mosaic unrolls the batched H-matmul over planes; bound code size / compile time.
    max_unroll = 128
    bc = max(1, min(nc, max_unroll, budget // max(per_plane, 1)))

    # ---- grid: >= 2 even steps (v7x megacore), ragged nc handled by padding ----
    steps = pl.cdiv(nc, bc)
    if steps == 1 and nc >= 2:
        steps = 2
    if steps > 1 and steps % 2:
        steps += 1
    bc = pl.cdiv(nc, steps)
    nc_pad = bc * steps
    if nc_pad != nc:
        x_planes = jnp.pad(x_planes, ((0, nc_pad - nc), (0, 0), (0, 0)))

    out_planes = pl.pallas_call(
        _bilinear_upsample_kernel,
        out_shape=jax.ShapeDtypeStruct((nc_pad, h_out, w_out), dt),
        grid=(steps,),
        in_specs=[
            pl.BlockSpec((bc, h_in, w_in), lambda i: (i, 0, 0)),   # streamed (pipelined)
            pl.BlockSpec((h_out, h_in), lambda i: (0, 0)),         # constant -> resident
            pl.BlockSpec((w_in, w_out), lambda i: (0, 0)),         # constant -> resident
        ],
        out_specs=pl.BlockSpec((bc, h_out, w_out), lambda i: (i, 0, 0)),
        compiler_params=pltpu.CompilerParams(
            dimension_semantics=("parallel",),
            vmem_limit_bytes=vmem_limit),
    )(x_planes, mh, mwt)

    return out_planes[:nc].reshape(n, c, h_out, w_out)


if __name__ == "__main__":
    # Primary check: exact 2x upsample (typical UNet decoder step).
    N, C, H, W = 2, 4, 16, 16
    x = jax.random.normal(jax.random.PRNGKey(0), (N, C, H, W), jnp.float32)
    tgt = (N, C, 2 * H, 2 * W)
    out = jax.block_until_ready(upsample_unet_forward(x, (tgt[2], tgt[3])))
    # Pure-XLA reference (half-pixel-center bilinear == PyTorch align_corners=False).
    ref = jax.image.resize(x, tgt, method="bilinear")
    assert out.shape == tgt and out.dtype == x.dtype, (out.shape, out.dtype)
    err = float(jnp.max(jnp.abs(out - ref)))
    assert jnp.allclose(out, ref, atol=1e-4, rtol=1e-4), err

    # Secondary check: non-integer scale, odd sizes, ragged N*C (exercises the
    # edge clamping and the plane-padding path).
    x2 = jax.random.normal(jax.random.PRNGKey(1), (1, 3, 17, 13), jnp.float32)
    tgt2 = (1, 3, 40, 36)
    out2 = jax.block_until_ready(upsample_unet_forward(x2, (tgt2[2], tgt2[3])))
    ref2 = jax.image.resize(x2, tgt2, method="bilinear")
    err2 = float(jnp.max(jnp.abs(out2 - ref2)))
    assert out2.shape == tgt2 and out2.dtype == x2.dtype
    assert jnp.allclose(out2, ref2, atol=1e-4, rtol=1e-4), err2

    print("KERNEL_OK")
</pallas_src>

<mosaic_0001>
module attributes {stable_mosaic.version = 11 : i64} {
  func.func @_bilinear_upsample_kernel(%arg0: i32, %arg1: memref<4x16x16xf32, #tpu.memory_space<vmem>>, %arg2: memref<32x16xf32, #tpu.memory_space<vmem>>, %arg3: memref<16x32xf32, #tpu.memory_space<vmem>>, %arg4: memref<4x32x32xf32, #tpu.memory_space<vmem>>) attributes {dimension_semantics = [#tpu.dimension_semantics<parallel>], iteration_bounds = array<i64: 2>, scalar_prefetch = 0 : i64, scratch_operands = 0 : i64, tpu.core_type = #tpu.core_type<tc>, window_params = [{transform_indices = @transform_0, window_bounds = array<i64: 4, 16, 16>}, {pipeline_mode = #tpu.pipeline_mode<synchronous>, transform_indices = @transform_1, window_bounds = array<i64: 32, 16>}, {pipeline_mode = #tpu.pipeline_mode<synchronous>, transform_indices = @transform_2, window_bounds = array<i64: 16, 32>}, {transform_indices = @transform_3, window_bounds = array<i64: 4, 32, 32>}]} {
    %c0 = arith.constant 0 : index
    %c0_0 = arith.constant 0 : index
    %0 = vector.load %arg2[%c0, %c0_0] : memref<32x16xf32, #tpu.memory_space<vmem>>, vector<32x16xf32>
    %1 = vector.shape_cast %0 : vector<32x16xf32> to vector<1x32x16xf32>
    %2 = vector.shape_cast %1 : vector<1x32x16xf32> to vector<1x32x16xf32>
    %3 = vector.broadcast %2 : vector<1x32x16xf32> to vector<4x32x16xf32>
    %c0_1 = arith.constant 0 : index
    %c0_2 = arith.constant 0 : index
    %c0_3 = arith.constant 0 : index
    %4 = vector.load %arg1[%c0_1, %c0_2, %c0_3] : memref<4x16x16xf32, #tpu.memory_space<vmem>>, vector<4x16x16xf32>
    %cst = arith.constant dense<0.000000e+00> : vector<4x32x16xf32>
    %5 = tpu.matmul %3, %4, %cst {dimension_numbers = #tpu.dot_dimension_numbers<[2], [1], [1], [2], [0, 0, 0, 1, 1, 2], [0], [0]>} : vector<4x32x16xf32>, vector<4x16x16xf32>, vector<4x32x16xf32> -> vector<4x32x16xf32>
    %6 = vector.shape_cast %5 : vector<4x32x16xf32> to vector<128x16xf32>
    %c0_4 = arith.constant 0 : index
    %c0_5 = arith.constant 0 : index
    %7 = vector.load %arg3[%c0_4, %c0_5] : memref<16x32xf32, #tpu.memory_space<vmem>>, vector<16x32xf32>
    %cst_6 = arith.constant dense<0.000000e+00> : vector<128x32xf32>
    %8 = tpu.matmul %6, %7, %cst_6 {dimension_numbers = #tpu.dot_dimension_numbers<[1], [0], [0], [1], [0, 0, 1, 1], [], []>} : vector<128x16xf32>, vector<16x32xf32>, vector<128x32xf32> -> vector<128x32xf32>
    %9 = vector.shape_cast %8 : vector<128x32xf32> to vector<4x32x32xf32>
    %c0_7 = arith.constant 0 : index
    %c0_8 = arith.constant 0 : index
    %c0_9 = arith.constant 0 : index
    %10 = vector.load %arg4[%c0_7, %c0_8, %c0_9] : memref<4x32x32xf32, #tpu.memory_space<vmem>>, vector<4x32x32xf32>
    tpu.vector_store %arg4[%c0_7, %c0_8, %c0_9], %9 {strides = array<i32>} : memref<4x32x32xf32, #tpu.memory_space<vmem>>, vector<4x32x32xf32>,
    return
  }
  func.func @transform_0(%arg0: i32) -> (i32, i32, i32) {
    %c0_i32 = arith.constant 0 : i32
    %c0_i32_0 = arith.constant 0 : i32
    %c0_i32_1 = arith.constant 0 : i32
    return %arg0, %c0_i32, %c0_i32_0 : i32, i32, i32
  }
  func.func @transform_1(%arg0: i32) -> (i32, i32) {
    %c0_i32 = arith.constant 0 : i32
    %c0_i32_0 = arith.constant 0 : i32
    %c0_i32_1 = arith.constant 0 : i32
    return %c0_i32, %c0_i32_0 : i32, i32
  }
  func.func @transform_2(%arg0: i32) -> (i32, i32) {
    %c0_i32 = arith.constant 0 : i32
    %c0_i32_0 = arith.constant 0 : i32
    %c0_i32_1 = arith.constant 0 : i32
    return %c0_i32, %c0_i32_0 : i32, i32
  }
  func.func @transform_3(%arg0: i32) -> (i32, i32, i32) {
    %c0_i32 = arith.constant 0 : i32
    %c0_i32_0 = arith.constant 0 : i32
    %c0_i32_1 = arith.constant 0 : i32
    return %arg0, %c0_i32, %c0_i32_0 : i32, i32, i32
  }
}

</mosaic_0001>

<bundles_post_ra>
// kernel: tpu_custom_call.1
= control target key start
LH: loop header
LB: loop body
LE: loop exit
PB: predicated region body
PF: predicated region fallthrough
CT: control target
= control target key end

     0   :  { %8 = vsyncpa [#allocation3], 0  ;;  %s1463_s0 = inlined_call_operand.hbm [shape: f32[8,16,16], index: 0, kind: input, shape index: {}]   ;;  %s1464_s1 = inlined_call_operand.vmem [shape: f32[32,16], index: 1, kind: input, shape index: {}]   ;;  %s1465_s2 = inlined_call_operand.vmem [shape: f32[16,32], index: 2, kind: input, shape index: {}]   ;;  %s1466_s3 = inlined_call_operand.hbm [shape: f32[8,32,32], index: 3, kind: output, shape index: {}]  }
   0x1   :  { %10 = vsyncpa [#allocation3 + $0x1], 0 }
   0x2   :  { %11 = vsyncpa [#allocation4], 0 }
   0x3   :  { %13 = vsyncpa [#allocation4 + $0x1], 0  ;;  %s1215_s12 = smov 0   ;;  %s1217_s13 = smov 0  }
   0x4   :  { %s1219_s14 = smov 0   ;;  %s1221_s15 = smov 0  }
   0x5 LB: > { %s1236_s16 = sadd.s32 4294967295, %s1187_s15   ;;  %s857_s17 = sadd.s32 4294967294, %s1187_s15   ;;  %s1187_s15 = sphi %s1221_s15, %s1479_s15   ;;  %s1183_s14 = sphi %s1219_s14, %s1478_s14   ;;  %s1179_s13 = sphi %s1217_s13, %s1477_s13   ;;  %s1175_s12 = sphi %s1215_s12, %s1476_s12  }
   0x6   : > { %s1240_s18 = sadd.s32 1, %s1187_s15   ;;  %s26_s19 = sadd.s32 1, %s1183_s14 }
   0x7   : > { %s23_s20 = ssub.s32 %s1187_s15, %s1240_s18  ;;  %p33_p0 = scmp.ne.s32.totalorder %s1183_s14, %s1179_s13 }
   0x8   : > { %p24_p1 = scmp.eq.s32.totalorder %s23_s20, 0  ;;  %p34_p2 = scmp.eq.s32.totalorder %s1187_s15, 0 }
   0x9   : > { %p39_p3 = scmp.ne.s32.totalorder %s1179_s13, %s1175_s12  ;;  %p40_p4 = scmp.eq.s32.totalorder %s1236_s16, 0 }
   0xa   : > { %s1252_s21 = scalar_select %p24_p1, %s1183_s14, %s26_s19  }
   0xb   : > { %p1254_p5 = por %p34_p2, %p33_p0  ;;  %p1258_p6 = por %p40_p4, %p39_p3 }
   0xc   : > { %p105_p7 = scmp.eq.s32.totalorder %s1236_s16, 1  ;;  %p111_p8 = scmp.eq.s32.totalorder %s857_s17, 1 }
   0xd   : > { %p1053_p10 = scmp.lt.s32.totalorder %s1187_s15, 2  ;;  %s137_s26 = sand.u32 1, %s1183_s14  }
   0xe   : > { %p1265_p11 = por %p105_p7, %p33_p0  ;;  %p1269_p12 = por %p111_p8, %p39_p3 }
   0xf   : > { %s906_s27 = sshll.u32 %s1187_s15, 10  ;;  %s860_s28 = sshll.u32 %s137_s26, 6 }
  0x10   : > { %s1470_s24 = scalar_select %p1265_p11, 1, 0 }
  0x11   : > { %s1471_s25 = scalar_select %p1269_p12, 1, 0 }
  0x12   : > { %s1278_s4 = scalar_lea.hbm %s1463_s0, %s906_s27  ;;  %s141_s5 = scalar_lea.vmem [#allocation2], %s860_s28 }
  0x13   : > { %s149_s6 = sshll.u32 %s141_s5, 4  ;;  %p1282_p13 = pnand %p1053_p10, %p1254_p5  ;;  %s1286_s6 = int_to_ptr.vmem [resolvable:$true] %s149_s6 }
  0x14   : > { %s1288_s8 = scalar_lea.sflag [#allocation3], %s137_s26  ;;  %s1091_s9 = scalar_lea.hbm %s1278_s4, 1024 }
  0x15   : > { %p1092_p0 = scmp.ne.s32.totalorder %s1278_s4, %s1091_s9  ;;  %p1093_p1 = pneg %p1282_p13 }
  0x16   : > { %s1096_s17 = scalar_lea.hbm %s1463_s0, 2048  ;;  %p1097_p4 = scmp.lt.u32.totalorder %s1278_s4, %s1463_s0 }
  0x17   : > { %p1094_p2 = pnand %p1093_p1, %p1092_p0  ;;  %p1098_p5 = scmp.lt.u32.totalorder %s1096_s17, %s1091_s9 }
  0x18   : > { %p1100_p8 = scmp.lt.u32.totalorder %s1091_s9, %s1278_s4 }
  0x19   : > { %p1095_p3 = pneg %p1094_p2  ;;  %p1099_p7 = por %p1098_p5, %p1097_p4 }
  0x1b   : > { %p1101_p10 = por %p1100_p8, %p1099_p7 }
  0x1d   : > { %p1102_p9 = pnand %p1101_p10, %p1095_p3 }
  0x1f   : > { %1105 = shalt.err (!%p1102_p9)
}
  0x20   : > { %s1106_s22 = scalar_lea.vmem %s1286_s6, 1024  ;;  %s1189_s26 = smov [#allocation2]  }
  0x21   : > { %p1107_p0 = scmp.ne.s32.totalorder %s1286_s6, %s1106_s22  ;;  %s1111_s27 = sshll.u32 %s1189_s26, 4  ;;  %s1112_s27 = int_to_ptr.vmem [resolvable:$false] %s1111_s27 }
  0x22   : > { %s1113_s28 = scalar_lea.vmem %s1112_s27, 2048  ;;  %p1114_p11 = scmp.lt.s32.totalorder %s1286_s6, %s1112_s27 }
  0x23   : > { %p1109_p2 = pnand %p1107_p0, %p1093_p1  ;;  %p1115_p4 = scmp.lt.s32.totalorder %s1113_s28, %s1106_s22 }
  0x25   : > { %p1110_p12 = pneg %p1109_p2  ;;  %p1116_p5 = por %p1115_p4, %p1114_p11 }
  0x27   : > { %p1117_p7 = pnand %p1116_p5, %p1110_p12 }
  0x29   : > { %1120 = shalt.err (!%p1117_p7)
}
  0x2a   : > { %s1190_s29 = smov 128   ;;  %s1191_s30 = smov 8  }
  0x2b   : > { %1048 = dma.hbm_to_vmem [thread:$0]  (!%p1282_p13), %s1278_s4, 1024, %s1286_s6, %s1288_s8, %s1190_s29, %s1190_s29, %s1191_s30  }
  0x2c   : > { %p864_p9 = scmp.ge.s32.totalorder %s1187_s15, 1  ;;  %p157_p1 = scmp.lt.s32.totalorder %s1187_s15, 3 }
  0x2e   : > { %p158_p3 = pnand %p864_p9, %p157_p1 }
  0x2f   : > { %s1319_s5 = sand.u32 (!%p158_p3), 1, %s1179_s13  }
  0x30   : > { %161 = sbr.rel (%p158_p3) target bundleno = 525 (0x20d), region = 32  ;;  %s865_s9 = sshll.u32 (!%p158_p3), %s1319_s5, 6 }
  0x31   : > { %s164_s10 = scalar_lea.sflag (!%p158_p3), [#allocation3], %s1319_s5  ;;  %s167_s11 = scalar_lea.vmem (!%p158_p3), [#allocation2], %s865_s9 }
  0x37   : > { %1166 = dma.done.wait (%p1258_p6), %s164_s10, 1024  }
  0x38   : > { %1168 = vsyncadd (%p1258_p6), %s164_s10, 4294966272  ;;  %vm204_vm0 = vcmask 130048   ;;  %v196_v0 = vld [vmem:[%s167_s11] sm:$0xff]  ;;  %v197_v1 = vld [vmem:[%s167_s11 + $0x8] sm:$0xff]  ;;  %s866_s29 = sshll.u32 %s1319_s5, 7  ;;  %vm752_vm1 = vcmask 261120  }
  0x39   : > { %v192_v2 = vld [vmem:[%s1464_s1] sm:$0xff]  ;;  %v1019_v3 = vpack.c.bf16 %v197_v1, %v196_v0  ;;  %v201_v5 = vld [vmem:[%s167_s11 + $0x28] sm:$0xff]  ;;  %v198_v7 = vld [vmem:[%s167_s11 + $0x10] sm:$0xff]  ;;  %s1378_s30 = scalar_lea.vmem [#allocation5], %s866_s29  ;;  %s908_s9 = sshll.u32 %s1236_s16, 11 }
  0x3a   : > { %955 = vmatprep.mubr.msk.f32.mxu0 %vm204_vm0, %v192_v2  ;;  %v200_v4 = vld [vmem:[%s167_s11 + $0x20] sm:$0xff]  ;;  %965 = vmatprep.mubr.msk.f32.mxu1 %vm204_vm0, %v192_v2  ;;  %v199_v8 = vld [vmem:[%s167_s11 + $0x18] sm:$0xff]  ;;  %v202_v9 = vld [vmem:[%s167_s11 + $0x30] sm:$0xff]  ;;  %s784_s10 = sshll.u32 %s1378_s30, 4  ;;  %s1413_s6 = scalar_lea.hbm %s1466_s3, %s908_s9  ;;  %s1415_s10 = int_to_ptr.vmem [resolvable:$true] %s784_s10 }
  0x3b   : > { %v1027_v6 = vpack.c.bf16 %v201_v5, %v200_v4  ;;  %1020 = vmatprep.subr.bf16.mxu0 %v1019_v3  ;;  %v203_v10 = vld [vmem:[%s167_s11 + $0x38] sm:$0xff]  ;;  %v193_v11 = vld [vmem:[%s1464_s1 + $0x8] sm:$0xff]  ;;  %v1023_v12 = vpack.c.bf16 %v199_v8, %v198_v7  ;;  %v557_v13 = vld [vmem:[%s1465_s2] sm:$0xff]  ;;  %s770_s16 = scalar_lea.sflag [#allocation4], %s1319_s5  ;;  %s1121_s23 = scalar_lea.vmem %s1415_s10, 2048 }
  0x3c   : > { %1022 = vmatpush3.bf16.msra.mxu0 %v1019_v3  ;;  %v558_v14 = vld [vmem:[%s1465_s2 + $0x8] sm:$0xff]  ;;  %v194_v15 = vld [vmem:[%s1464_s1 + $0x10] sm:$0xff]  ;;  %v1031_v16 = vpack.c.bf16 %v203_v10, %v202_v9  ;;  %v195_v18 = vld [vmem:[%s1464_s1 + $0x18] sm:$0xff]  ;;  %p1122_p6 = scmp.ne.s32.totalorder %s1415_s10, %s1121_s23  ;;  %p1473_p11 = scmp.ne.s32.totalorder %s1470_s24, 0 }
  0x3d   : > { %1028 = vmatprep.subr.bf16.mxu0 %v1027_v6  ;;  %v1035_v17 = vpack.c.bf16 %v558_v14, %v557_v13  ;;  %1024 = vmatprep.subr.bf16.mxu1 %v1023_v12  ;;  %s1192_s7 = smov [#allocation5]  }
  0x3e   : > { %1026 = vmatpush3.bf16.msra.mxu1 %v1023_v12  ;;  %p1123_p12 = pnand %p1122_p6, %p1473_p11  ;;  %s1125_s8 = sshll.u32 %s1192_s7, 4  ;;  %s1126_s8 = int_to_ptr.vmem [resolvable:$false] %s1125_s8 }
  0x3f   : > { %956 = vmatmul.mubr.msk.f32.vlgmr.msra.gmra.mrb[0].mxu0 %vm204_vm0, %v193_v11  ;;  %1032 = vmatprep.subr.bf16.mxu1 %v1031_v16  ;;  %s1127_s17 = scalar_lea.vmem %s1126_s8, 4096  ;;  %p1128_p8 = scmp.lt.s32.totalorder %s1415_s10, %s1126_s8 }
  0x40   : > { %1030 = vmatpush3.bf16.msra.mxu0 %v1027_v6  ;;  %958 = vmatprep.mubr.msk.f32.mxu0 %vm204_vm0, %v194_v15  ;;  %p1124_p13 = pneg %p1123_p12  ;;  %p1129_p10 = scmp.lt.s32.totalorder %s1127_s17, %s1121_s23 }
  0x41   : > { %1036 = vmatprep.subr.bf16.mxu0 %v1035_v17  ;;  %966 = vmatmul.mubr.msk.f32.vlgmr.msra.gmra.mrb[0].mxu1 %vm204_vm0, %v193_v11 }
  0x42   : > { %1034 = vmatpush3.bf16.msra.mxu1 %v1031_v16  ;;  %968 = vmatprep.mubr.msk.f32.mxu1 %vm204_vm0, %v194_v15  ;;  %p1130_p0 = por %p1129_p10, %p1128_p8 }
  0x43   : > { %959 = vmatmul.mubr.msk.f32.gmra.mrb[2].mxu0 %vm204_vm0, %v195_v18  ;;  %1039 = vmatprep.subr.bf16.mxu1 %v1035_v17 }
  0x44   : > { %975 = vmatprep.mubr.msk.f32.mxu0 %vm204_vm0, %v192_v2  ;;  %p1131_p2 = pnand %p1130_p0, %p1124_p13 }
  0x45   : > { %969 = vmatmul.mubr.msk.f32.gmra.mrb[2].mxu1 %vm204_vm0, %v195_v18 }
  0x46   : > { %985 = vmatprep.mubr.msk.f32.mxu1 %vm204_vm0, %v192_v2 }
  0x47   : > { %976 = vmatmul.mubr.msk.f32.vlgmr.msra.gmra.mrb[4].mxu0 %vm204_vm0, %v193_v11 }
  0x48   : > { %978 = vmatprep.mubr.msk.f32.mxu0 %vm204_vm0, %v194_v15  ;;  %1038 = vmatpush3.bf16.msra.mxu0 %v1035_v17 }
  0x49   : > { %986 = vmatmul.mubr.msk.f32.vlgmr.msra.gmra.mrb[4].mxu1 %vm204_vm0, %v193_v11 }
  0x4a   : > { %988 = vmatprep.mubr.msk.f32.mxu1 %vm204_vm0, %v194_v15  ;;  %1040 = vmatpush3.bf16.msra.mxu1 %v1035_v17 }
  0x4b   : > { %979 = vmatmul.mubr.msk.f32.gmra.mrb[6].mxu0 %vm204_vm0, %v195_v18 }
  0x4d   : > { %989 = vmatmul.mubr.msk.f32.gmra.mrb[6].mxu1 %vm204_vm0, %v195_v18 }
 0x112   : > { %v957_v19 = vpop.f32.mrb[0].mxu0 }
 0x113   : > { %v283_v20 = vpop.f32.mrb[1].mxu0 }
 0x114   : > { %995 = vmatprep.mubr.msk.f32.mxu0 %vm204_vm0, %v283_v20  ;;  %v967_v21 = vpop.f32.mrb[0].mxu1 }
 0x115   : > { %996 = vmatmul.mubr.msk.f32.vlgmr.msra.gmra.mrb[8].mxu0 %vm204_vm0, %v957_v19  ;;  %v368_v23 = vpop.f32.mrb[1].mxu1 }
 0x116   : > { %v960_v22 = vpop.f32.mrb[2].mxu0 }
 0x117   : > { %v293_v24 = vpop.f32.mrb[3].mxu0 }
 0x118   : > { %998 = vmatprep.mubr.msk.f32.mxu0 %vm204_vm0, %v293_v24  ;;  %v970_v25 = vpop.f32.mrb[2].mxu1 }
 0x119   : > { %999 = vmatmul.mubr.msk.f32.gmra.mrb[10].mxu0 %vm204_vm0, %v960_v22  ;;  %v378_v27 = vpop.f32.mrb[3].mxu1 }
 0x11a   : > { %v977_v26 = vpop.f32.mrb[4].mxu0  ;;  %1001 = vmatprep.mubr.msk.f32.mxu0 %vm204_vm0, %v368_v23 }
 0x11b   : > { %v453_v28 = vpop.f32.mrb[5].mxu0 }
 0x11c   : > { %1007 = vmatprep.mubr.msk.f32.mxu1 %vm204_vm0, %v453_v28  ;;  %v987_v29 = vpop.f32.mrb[4].mxu1 }
 0x11d   : > { %1002 = vmatmul.mubr.msk.f32.gmra.mrb[12].mxu0 %vm204_vm0, %v967_v21  ;;  %1008 = vmatmul.mubr.msk.f32.vlgmr.msra.gmra.mrb[8].mxu1 %vm204_vm0, %v977_v26  ;;  %v538_v31 = vpop.f32.mrb[5].mxu1 }
 0x11e   : > { %v980_v30 = vpop.f32.mrb[6].mxu0  ;;  %1004 = vmatprep.mubr.msk.f32.mxu0 %vm204_vm0, %v378_v27 }
 0x11f   : > { %v463_v32 = vpop.f32.mrb[7].mxu0 }
 0x120   : > { %1010 = vmatprep.mubr.msk.f32.mxu1 %vm204_vm0, %v463_v32  ;;  %v990_v33 = vpop.f32.mrb[6].mxu1 }
 0x121   : > { %1005 = vmatmul.mubr.msk.f32.gmra.mrb[14].mxu0 %vm204_vm0, %v970_v25  ;;  %1011 = vmatmul.mubr.msk.f32.gmra.mrb[10].mxu1 %vm204_vm0, %v980_v30  ;;  %v548_v34 = vpop.f32.mrb[7].mxu1 }
 0x122   : > { %1013 = vmatprep.mubr.msk.f32.mxu1 %vm204_vm0, %v538_v31 }
 0x125   : > { %1014 = vmatmul.mubr.msk.f32.gmra.mrb[12].mxu1 %vm204_vm0, %v987_v29 }
 0x126   : > { %1016 = vmatprep.mubr.msk.f32.mxu1 %vm204_vm0, %v548_v34 }
 0x129   : > { %1017 = vmatmul.mubr.msk.f32.gmra.mrb[14].mxu1 %vm204_vm0, %v990_v33 }
 0x1e8   : > { %v997_v35 = vpop.f32.mrb[8].mxu0 }
 0x1e9   : > { %754 = vst.msk [vmem:[%s1378_s30 + $0x8] sm:$0xff] %vm752_vm1, %v997_v35  ;;  %v673_v36 = vpop.f32.mrb[9].mxu0 }
 0x1ea   : > { %753 = vst.msk [vmem:[%s1378_s30] sm:$0xff] %vm752_vm1, %v673_v36 }
 0x1ec   : > { %v1000_v37 = vpop.f32.mrb[10].mxu0 }
 0x1ed   : > { %756 = vst.msk [vmem:[%s1378_s30 + $0x18] sm:$0xff] %vm752_vm1, %v1000_v37  ;;  %v683_v38 = vpop.f32.mrb[11].mxu0 }
 0x1ee   : > { %755 = vst.msk [vmem:[%s1378_s30 + $0x10] sm:$0xff] %vm752_vm1, %v683_v38 }
 0x1f0   : > { %v1003_v39 = vpop.f32.mrb[12].mxu0  ;;  %v1009_v40 = vpop.f32.mrb[8].mxu1 }
 0x1f1   : > { %758 = vst.msk [vmem:[%s1378_s30 + $0x28] sm:$0xff] %vm752_vm1, %v1003_v39  ;;  %762 = vst.msk [vmem:[%s1378_s30 + $0x48] sm:$0xff] %vm752_vm1, %v1009_v40  ;;  %v693_v41 = vpop.f32.mrb[13].mxu0  ;;  %v713_v42 = vpop.f32.mrb[9].mxu1 }
 0x1f2   : > { %757 = vst.msk [vmem:[%s1378_s30 + $0x20] sm:$0xff] %vm752_vm1, %v693_v41  ;;  %761 = vst.msk [vmem:[%s1378_s30 + $0x40] sm:$0xff] %vm752_vm1, %v713_v42 }
 0x1f4   : > { %v1006_v43 = vpop.f32.mrb[14].mxu0  ;;  %v1012_v44 = vpop.f32.mrb[10].mxu1 }
 0x1f5   : > { %760 = vst.msk [vmem:[%s1378_s30 + $0x38] sm:$0xff] %vm752_vm1, %v1006_v43  ;;  %764 = vst.msk [vmem:[%s1378_s30 + $0x58] sm:$0xff] %vm752_vm1, %v1012_v44  ;;  %v703_v45 = vpop.f32.mrb[15].mxu0  ;;  %v723_v46 = vpop.f32.mrb[11].mxu1 }
 0x1f6   : > { %759 = vst.msk [vmem:[%s1378_s30 + $0x30] sm:$0xff] %vm752_vm1, %v703_v45  ;;  %763 = vst.msk [vmem:[%s1378_s30 + $0x50] sm:$0xff] %vm752_vm1, %v723_v46 }
 0x1f8   : > { %v1015_v47 = vpop.f32.mrb[12].mxu1 }
 0x1f9   : > { %766 = vst.msk [vmem:[%s1378_s30 + $0x68] sm:$0xff] %vm752_vm1, %v1015_v47  ;;  %v733_v48 = vpop.f32.mrb[13].mxu1 }
 0x1fa   : > { %765 = vst.msk [vmem:[%s1378_s30 + $0x60] sm:$0xff] %vm752_vm1, %v733_v48 }
 0x1fc   : > { %v1018_v49 = vpop.f32.mrb[14].mxu1 }
 0x1fd   : > { %768 = vst.msk [vmem:[%s1378_s30 + $0x78] sm:$0xff] %vm752_vm1, %v1018_v49  ;;  %v743_v50 = vpop.f32.mrb[15].mxu1 }
 0x1fe   : > { %767 = vst.msk [vmem:[%s1378_s30 + $0x70] sm:$0xff] %vm752_vm1, %v743_v50 }
 0x1ff   : > { %1134 = shalt.err (!%p1131_p2)
}
 0x200   : > { %s1135_s19 = scalar_lea.hbm %s1413_s6, 2048  ;;  %s1139_s26 = scalar_lea.hbm %s1466_s3, 4096 }
 0x201   : > { %p1136_p4 = scmp.ne.s32.totalorder %s1413_s6, %s1135_s19  ;;  %p1140_p9 = scmp.lt.u32.totalorder %s1413_s6, %s1466_s3 }
 0x202   : > { %p1141_p1 = scmp.lt.u32.totalorder %s1139_s26, %s1135_s19  ;;  %p1143_p6 = scmp.lt.u32.totalorder %s1135_s19, %s1413_s6 }
 0x203   : > { %p1137_p5 = pnand %p1136_p4, %p1473_p11 }
 0x204   : > { %p1142_p3 = por %p1141_p1, %p1140_p9 }
 0x205   : > { %p1138_p7 = pneg %p1137_p5 }
 0x206   : > { %p1144_p12 = por %p1143_p6, %p1142_p3 }
 0x208   : > { %p1145_p13 = pnand %p1144_p12, %p1138_p7 }
 0x20a   : > { %1148 = shalt.err (!%p1145_p13)
}
 0x20b   : > { %s1193_s29 = smov 128   ;;  %s1194_s30 = smov 8  }
 0x20c   : > { %1043 = dma.vmem_to_hbm [thread:$0]  (%p1473_p11), %s1415_s10, 2048, %s1413_s6, %s770_s16, %s1193_s29, %s1193_s29, %s1194_s30  }
 0x20d PF: > { %s799_s9 = sand.u32 1, %s1175_s12   ;;  %p1474_p8 = scmp.ne.s32.totalorder %s1471_s25, 0 }
 0x20e   : > { %p1475_p10 = scmp.ge.s32.totalorder %s1187_s15, 2  ;;  %s800_s11 = scalar_lea.sflag [#allocation4], %s799_s9 }
 0x210   : > { %p1050_p0 = pnand %p1475_p10, %p1474_p8 }
 0x212   : > { %1170 = dma.done.wait (!%p1050_p0), %s800_s11, 2048  }
 0x213   : > { %1172 = vsyncadd (!%p1050_p0), %s800_s11, 4294965248  ;;  %p16_p2 = scmp.ge.s32.totalorder %s1240_s18, 4   ;;  %s1476_s12 = smov %s1179_s13 }
 0x214   : > { %s1477_s13 = smov %s1183_s14  ;;  %s1478_s14 = smov %s1252_s21 }
 0x215   : > { %s1479_s15 = smov %s1240_s18  ;;  %18 = sbr.rel (!%p16_p2) target bundleno = 5 (0x5), region = 77 }
 0x21c   :  { %805 = vsyncpa [#allocation3], 1 }
 0x21d   :  { %807 = vsyncpa [#allocation3 + $0x1], 1 }
 0x21e   :  { %808 = vsyncpa [#allocation4], 1 }
 0x21f   :  { %810 = vsyncpa [#allocation4 + $0x1], 1 }

</bundles_post_ra>
